<compile_context>
chip_gen: v7x
topology: tpu7x:2x2x1
jax: 0.10.0
libtpu: 0.0.40
codegen_flags: <defaults>
</compile_context>

<pallas_src>
import jax
import jax.numpy as jnp
from jax.experimental import pallas as pl
from jax.experimental.pallas import tpu as pltpu


def _round_up(x, m):
    return ((x + m - 1) // m) * m


# ----------------------------------------------------------------------------
# Kernel
# ----------------------------------------------------------------------------
def dgm_kernel(x_ref, xw_ref, xb_ref, wzgr_ref, wh_ref, wout_ref, bout_ref,
               out_ref):
    """One batch tile (TM rows) of the full DGM forward.

    Shapes (lp = padded layer_size, op = padded out_dim, L = layer_count):
      x_ref    : (TM, in_dim)              f32
      xw_ref   : (in_dim, (1+4L)*lp)       bf16   [W1 | Uz|Ug|Ur|Uh per layer]
      xb_ref   : (1, (1+4L)*lp)            f32    [b1 | bz|bg|br|bh per layer]
      wzgr_ref : (L, lp, 3*lp)             bf16   [Wz|Wg|Wr] per layer
      wh_ref   : (L, lp, lp)               bf16
      wout_ref : (lp, op)                  bf16
      bout_ref : (1, op)                   f32
      out_ref  : (TM, op)                  f32
    """
    lp = wh_ref.shape[2]
    layer_count = wzgr_ref.shape[0]

    # Prologue: ALL temp-independent matmuls + bias adds in one wide shot.
    x_mxu = x_ref[...].astype(xw_ref.dtype)
    xa = (jnp.dot(x_mxu, xw_ref[...], preferred_element_type=jnp.float32)
          + xb_ref[...])                               # (TM, (1+4L)*lp) f32

    # self.first: ReLU(x @ W1 + b1)  (first lp-wide chunk of the prologue).
    temp = jnp.maximum(xa[:, :lp], 0.0)                # (TM, lp) f32

    # Small static unroll over DGM_LSTM layers (layer_count is small).
    for l in range(layer_count):
        base = lp + l * 4 * lp
        xa_zgr = xa[:, base:base + 3 * lp]             # x@[Uz|Ug|Ur] + biases
        xa_h = xa[:, base + 3 * lp:base + 4 * lp]      # x@Uh + bh

        zgr = jnp.tanh(
            xa_zgr + jnp.dot(temp.astype(wzgr_ref.dtype), wzgr_ref[l],
                             preferred_element_type=jnp.float32))
        z = zgr[:, 0 * lp:1 * lp]
        g = zgr[:, 1 * lp:2 * lp]
        r = zgr[:, 2 * lp:3 * lp]

        h = jnp.tanh(
            xa_h + jnp.dot((temp * r).astype(wh_ref.dtype), wh_ref[l],
                           preferred_element_type=jnp.float32))
        temp = (1.0 - g) * h + z * temp                # f32 gate math (VPU)

    # self.out: temp @ Wout + bout (lane-dense padded output store).
    out_ref[...] = (jnp.dot(temp.astype(wout_ref.dtype), wout_ref[...],
                            preferred_element_type=jnp.float32)
                    + bout_ref[...])


# ----------------------------------------------------------------------------
# Parameter packing (pad to 128 lanes, fuse gates + biases, bf16 MXU operands)
# ----------------------------------------------------------------------------
def prepare_params(raw, mxu_dtype=jnp.bfloat16):
    """Pack raw (unfused, unpadded, f32) DGM params for the kernel."""
    in_dim, layer_size = raw["w1"].shape
    layer_count = raw["uz"].shape[0]
    out_dim = raw["wout"].shape[1]
    lp = _round_up(layer_size, 128)
    op = _round_up(out_dim, 128)

    def pad_last(a, n):
        pad = [(0, 0)] * (a.ndim - 1) + [(0, n - a.shape[-1])]
        return jnp.pad(a, pad)

    def pad_last2(a, m, n):
        pad = ([(0, 0)] * (a.ndim - 2)
               + [(0, m - a.shape[-2]), (0, n - a.shape[-1])])
        return jnp.pad(a, pad)

    # Fused x-side weights: [W1 | per layer (Uz|Ug|Ur|Uh)], each padded to lp
    # columns  -> (in_dim, (1 + 4*layer_count)*lp).
    xw_blocks = [pad_last(raw["w1"], lp)]
    xb_blocks = [pad_last(raw["b1"], lp)]
    for l in range(layer_count):
        for wk, bk in (("uz", "bz"), ("ug", "bg"), ("ur", "br"), ("uh", "bh")):
            xw_blocks.append(pad_last(raw[wk][l], lp))
            xb_blocks.append(pad_last(raw[bk][l], lp))
    xw_all = jnp.concatenate(xw_blocks, axis=-1)
    xb_all = jnp.concatenate(xb_blocks, axis=-1)

    # Fused recurrent weights for z/g/r: (layer_count, lp, 3*lp).
    wzgr = jnp.stack(
        [jnp.concatenate([pad_last2(raw[k][l], lp, lp)
                          for k in ("wz", "wg", "wr")], axis=-1)
         for l in range(layer_count)])
    wh = jnp.stack([pad_last2(raw["wh"][l], lp, lp)
                    for l in range(layer_count)])

    packed = {
        "xw_all": xw_all.astype(mxu_dtype),
        "xb_all": xb_all.astype(jnp.float32),
        "wzgr": wzgr.astype(mxu_dtype),
        "wh": wh.astype(mxu_dtype),
        "wout": pad_last2(raw["wout"], lp, op).astype(mxu_dtype),
        "bout": pad_last(raw["bout"], op).astype(jnp.float32),
    }
    return packed, out_dim


# ----------------------------------------------------------------------------
# Wrapper
# ----------------------------------------------------------------------------
_PARAM_ORDER = ("xw_all", "xb_all", "wzgr", "wh", "wout", "bout")


def dgm_forward(x, packed, out_dim, *, tm=128):
    """Run the DGM forward as a single batch-tiled Pallas kernel."""
    n, in_dim = x.shape
    op = packed["wout"].shape[1]

    # Batch tile of TM rows (multiple of 8 sublanes); zero-pad batch to fit.
    tm = min(tm, _round_up(n, 8))
    tm = _round_up(tm, 8)
    n_pad = _round_up(n, tm)
    if n_pad != n:
        x = jnp.pad(x, ((0, n_pad - n), (0, 0)))

    def resident(a):
        # Whole array, VMEM-resident (same block index for every grid step).
        nd = a.ndim
        return pl.BlockSpec(a.shape, lambda i, _nd=nd: (0,) * _nd)

    in_specs = [pl.BlockSpec((tm, in_dim), lambda i: (i, 0))]
    in_specs += [resident(packed[k]) for k in _PARAM_ORDER]
    out_spec = pl.BlockSpec((tm, op), lambda i: (i, 0))

    # VMEM budget sized to the actual packed weights (safe on v7x's 64 MiB).
    param_bytes = sum(int(packed[k].size) * packed[k].dtype.itemsize
                      for k in _PARAM_ORDER)
    vmem_limit = min(max(4 * param_bytes + (16 << 20), 32 << 20), 64 << 20)

    out = pl.pallas_call(
        dgm_kernel,
        grid=(n_pad // tm,),
        in_specs=in_specs,
        out_specs=out_spec,
        out_shape=jax.ShapeDtypeStruct((n_pad, op), jnp.float32),
        compiler_params=pltpu.CompilerParams(
            dimension_semantics=("parallel",),
            vmem_limit_bytes=vmem_limit),
    )(x, *[packed[k] for k in _PARAM_ORDER])

    return out[:n, :out_dim]


# ----------------------------------------------------------------------------
# Synthetic parameters + pure-JAX reference
# ----------------------------------------------------------------------------
def make_params(key, in_dim, out_dim, layer_size, layer_count):
    """Deterministic synthetic parameters (shapes match DGM.__init__)."""
    ks = jax.random.split(key, 16)
    f32 = jnp.float32

    def rnd(k, shape, scale=0.1):
        return (scale * jax.random.normal(k, shape)).astype(f32)

    return {
        "w1": rnd(ks[0], (in_dim, layer_size)),
        "b1": rnd(ks[1], (1, layer_size)),
        "uz": rnd(ks[2], (layer_count, in_dim, layer_size)),
        "ug": rnd(ks[3], (layer_count, in_dim, layer_size)),
        "ur": rnd(ks[4], (layer_count, in_dim, layer_size)),
        "uh": rnd(ks[5], (layer_count, in_dim, layer_size)),
        "wz": rnd(ks[6], (layer_count, layer_size, layer_size)),
        "wg": rnd(ks[7], (layer_count, layer_size, layer_size)),
        "wr": rnd(ks[8], (layer_count, layer_size, layer_size)),
        "wh": rnd(ks[9], (layer_count, layer_size, layer_size)),
        # biases initialized to ones as in DGM_LSTM.__init__
        "bz": jnp.ones((layer_count, 1, layer_size), f32),
        "bg": jnp.ones((layer_count, 1, layer_size), f32),
        "br": jnp.ones((layer_count, 1, layer_size), f32),
        "bh": jnp.ones((layer_count, 1, layer_size), f32),
        "wout": rnd(ks[10], (layer_size, out_dim)),
        "bout": rnd(ks[11], (1, out_dim)),
    }


def dgm_forward_ref(x, raw):
    """Pure-JAX f32 reference of the same forward (for correctness check)."""
    temp = jnp.maximum(x @ raw["w1"] + raw["b1"], 0.0)
    layer_count = raw["uz"].shape[0]
    for l in range(layer_count):
        Z = jnp.tanh(x @ raw["uz"][l] + temp @ raw["wz"][l] + raw["bz"][l])
        G = jnp.tanh(x @ raw["ug"][l] + temp @ raw["wg"][l] + raw["bg"][l])
        R = jnp.tanh(x @ raw["ur"][l] + temp @ raw["wr"][l] + raw["br"][l])
        H = jnp.tanh(x @ raw["uh"][l]
                     + (temp * R) @ raw["wh"][l] + raw["bh"][l])
        temp = (1.0 - G) * H + Z * temp
    return temp @ raw["wout"] + raw["bout"]


if __name__ == "__main__":
    # Small shapes consistent with the module: x is (batch, in_dim).
    batch, in_dim, out_dim = 8, 4, 2
    layer_size, layer_count = 32, 3

    key = jax.random.PRNGKey(0)
    kx, kp = jax.random.split(key)
    x = jax.random.normal(kx, (batch, in_dim), dtype=jnp.float32)
    raw = make_params(kp, in_dim, out_dim, layer_size, layer_count)

    packed, od = prepare_params(raw)          # pad + fuse + bf16 MXU operands
    out = dgm_forward(x, packed, od)
    out = jax.block_until_ready(out)

    ref = dgm_forward_ref(x, raw)             # full f32 reference
    assert out.shape == (batch, out_dim)
    # bf16 MXU operands with f32 accumulation -> loosened tolerance vs f32 ref.
    assert jnp.allclose(out, ref, atol=5e-2, rtol=5e-2), "mismatch vs reference"

    print("KERNEL_OK")
</pallas_src>

<mosaic_0001>
module attributes {stable_mosaic.version = 11 : i64} {
  func.func @dgm_kernel(%arg0: i32, %arg1: memref<8x4xf32, #tpu.memory_space<vmem>>, %arg2: memref<4x1664xbf16, #tpu.memory_space<vmem>>, %arg3: memref<1x1664xf32, #tpu.memory_space<vmem>>, %arg4: memref<3x128x384xbf16, #tpu.memory_space<vmem>>, %arg5: memref<3x128x128xbf16, #tpu.memory_space<vmem>>, %arg6: memref<128x128xbf16, #tpu.memory_space<vmem>>, %arg7: memref<1x128xf32, #tpu.memory_space<vmem>>, %arg8: memref<8x128xf32, #tpu.memory_space<vmem>>) attributes {dimension_semantics = [#tpu.dimension_semantics<parallel>], iteration_bounds = array<i64: 1>, scalar_prefetch = 0 : i64, scratch_operands = 0 : i64, tpu.core_type = #tpu.core_type<tc>, window_params = [{transform_indices = @transform_0, window_bounds = array<i64: 8, 4>}, {pipeline_mode = #tpu.pipeline_mode<synchronous>, transform_indices = @transform_1, window_bounds = array<i64: 4, 1664>}, {pipeline_mode = #tpu.pipeline_mode<synchronous>, transform_indices = @transform_2, window_bounds = array<i64: 1, 1664>}, {pipeline_mode = #tpu.pipeline_mode<synchronous>, transform_indices = @transform_3, window_bounds = array<i64: 3, 128, 384>}, {pipeline_mode = #tpu.pipeline_mode<synchronous>, transform_indices = @transform_4, window_bounds = array<i64: 3, 128, 128>}, {pipeline_mode = #tpu.pipeline_mode<synchronous>, transform_indices = @transform_5, window_bounds = array<i64: 128, 128>}, {pipeline_mode = #tpu.pipeline_mode<synchronous>, transform_indices = @transform_6, window_bounds = array<i64: 1, 128>}, {transform_indices = @transform_7, window_bounds = array<i64: 8, 128>}]} {
    %c0 = arith.constant 0 : index
    %c0_0 = arith.constant 0 : index
    %0 = vector.load %arg1[%c0, %c0_0] : memref<8x4xf32, #tpu.memory_space<vmem>>, vector<8x4xf32>
    %1 = arith.truncf %0 : vector<8x4xf32> to vector<8x4xbf16>
    %c0_1 = arith.constant 0 : index
    %c0_2 = arith.constant 0 : index
    %2 = vector.load %arg2[%c0_1, %c0_2] : memref<4x1664xbf16, #tpu.memory_space<vmem>>, vector<4x1664xbf16>
    %cst = arith.constant dense<0.000000e+00> : vector<8x1664xf32>
    %3 = tpu.matmul %1, %2, %cst {dimension_numbers = #tpu.dot_dimension_numbers<[1], [0], [0], [1], [0, 0, 1, 1], [], []>} : vector<8x4xbf16>, vector<4x1664xbf16>, vector<8x1664xf32> -> vector<8x1664xf32>
    %c0_3 = arith.constant 0 : index
    %c0_4 = arith.constant 0 : index
    %4 = vector.load %arg3[%c0_3, %c0_4] : memref<1x1664xf32, #tpu.memory_space<vmem>>, vector<1x1664xf32>
    %5 = vector.broadcast %4 : vector<1x1664xf32> to vector<8x1664xf32>
    %6 = arith.addf %3, %5 : vector<8x1664xf32>
    %7 = vector.extract_strided_slice %6 {offsets = [0, 0], sizes = [8, 128], strides = [1, 1]} : vector<8x1664xf32> to vector<8x128xf32>
    %cst_5 = arith.constant 0.000000e+00 : f32
    %8 = vector.broadcast %cst_5 : f32 to vector<8x128xf32>
    %9 = arith.maximumf %7, %8 : vector<8x128xf32>
    %10 = vector.extract_strided_slice %6 {offsets = [0, 128], sizes = [8, 384], strides = [1, 1]} : vector<8x1664xf32> to vector<8x384xf32>
    %11 = vector.extract_strided_slice %6 {offsets = [0, 512], sizes = [8, 128], strides = [1, 1]} : vector<8x1664xf32> to vector<8x128xf32>
    %12 = arith.truncf %9 : vector<8x128xf32> to vector<8x128xbf16>
    %c0_6 = arith.constant 0 : index
    %c0_7 = arith.constant 0 : index
    %c0_8 = arith.constant 0 : index
    %13 = vector.load %arg4[%c0_6, %c0_7, %c0_8] : memref<3x128x384xbf16, #tpu.memory_space<vmem>>, vector<1x128x384xbf16>
    %14 = vector.shape_cast %13 : vector<1x128x384xbf16> to vector<128x384xbf16>
    %cst_9 = arith.constant dense<0.000000e+00> : vector<8x384xf32>
    %15 = tpu.matmul %12, %14, %cst_9 {dimension_numbers = #tpu.dot_dimension_numbers<[1], [0], [0], [1], [0, 0, 1, 1], [], []>} : vector<8x128xbf16>, vector<128x384xbf16>, vector<8x384xf32> -> vector<8x384xf32>
    %16 = arith.addf %10, %15 : vector<8x384xf32>
    %17 = math.tanh %16 : vector<8x384xf32>
    %18 = vector.extract_strided_slice %17 {offsets = [0, 0], sizes = [8, 128], strides = [1, 1]} : vector<8x384xf32> to vector<8x128xf32>
    %19 = vector.extract_strided_slice %17 {offsets = [0, 128], sizes = [8, 128], strides = [1, 1]} : vector<8x384xf32> to vector<8x128xf32>
    %20 = vector.extract_strided_slice %17 {offsets = [0, 256], sizes = [8, 128], strides = [1, 1]} : vector<8x384xf32> to vector<8x128xf32>
    %21 = arith.mulf %9, %20 : vector<8x128xf32>
    %22 = arith.truncf %21 : vector<8x128xf32> to vector<8x128xbf16>
    %c0_10 = arith.constant 0 : index
    %c0_11 = arith.constant 0 : index
    %c0_12 = arith.constant 0 : index
    %23 = vector.load %arg5[%c0_10, %c0_11, %c0_12] : memref<3x128x128xbf16, #tpu.memory_space<vmem>>, vector<1x128x128xbf16>
    %24 = vector.shape_cast %23 : vector<1x128x128xbf16> to vector<128x128xbf16>
    %cst_13 = arith.constant dense<0.000000e+00> : vector<8x128xf32>
    %25 = tpu.matmul %22, %24, %cst_13 {dimension_numbers = #tpu.dot_dimension_numbers<[1], [0], [0], [1], [0, 0, 1, 1], [], []>} : vector<8x128xbf16>, vector<128x128xbf16>, vector<8x128xf32> -> vector<8x128xf32>
    %26 = arith.addf %11, %25 : vector<8x128xf32>
    %27 = math.tanh %26 : vector<8x128xf32>
    %cst_14 = arith.constant 1.000000e+00 : f32
    %28 = vector.broadcast %cst_14 : f32 to vector<8x128xf32>
    %29 = arith.subf %28, %19 : vector<8x128xf32>
    %30 = arith.mulf %29, %27 : vector<8x128xf32>
    %31 = arith.mulf %18, %9 : vector<8x128xf32>
    %32 = arith.addf %30, %31 : vector<8x128xf32>
    %33 = vector.extract_strided_slice %6 {offsets = [0, 640], sizes = [8, 384], strides = [1, 1]} : vector<8x1664xf32> to vector<8x384xf32>
    %34 = vector.extract_strided_slice %6 {offsets = [0, 1024], sizes = [8, 128], strides = [1, 1]} : vector<8x1664xf32> to vector<8x128xf32>
    %35 = arith.truncf %32 : vector<8x128xf32> to vector<8x128xbf16>
    %c1 = arith.constant 1 : index
    %c0_15 = arith.constant 0 : index
    %c0_16 = arith.constant 0 : index
    %36 = vector.load %arg4[%c1, %c0_15, %c0_16] : memref<3x128x384xbf16, #tpu.memory_space<vmem>>, vector<1x128x384xbf16>
    %37 = vector.shape_cast %36 : vector<1x128x384xbf16> to vector<128x384xbf16>
    %cst_17 = arith.constant dense<0.000000e+00> : vector<8x384xf32>
    %38 = tpu.matmul %35, %37, %cst_17 {dimension_numbers = #tpu.dot_dimension_numbers<[1], [0], [0], [1], [0, 0, 1, 1], [], []>} : vector<8x128xbf16>, vector<128x384xbf16>, vector<8x384xf32> -> vector<8x384xf32>
    %39 = arith.addf %33, %38 : vector<8x384xf32>
    %40 = math.tanh %39 : vector<8x384xf32>
    %41 = vector.extract_strided_slice %40 {offsets = [0, 0], sizes = [8, 128], strides = [1, 1]} : vector<8x384xf32> to vector<8x128xf32>
    %42 = vector.extract_strided_slice %40 {offsets = [0, 128], sizes = [8, 128], strides = [1, 1]} : vector<8x384xf32> to vector<8x128xf32>
    %43 = vector.extract_strided_slice %40 {offsets = [0, 256], sizes = [8, 128], strides = [1, 1]} : vector<8x384xf32> to vector<8x128xf32>
    %44 = arith.mulf %32, %43 : vector<8x128xf32>
    %45 = arith.truncf %44 : vector<8x128xf32> to vector<8x128xbf16>
    %c1_18 = arith.constant 1 : index
    %c0_19 = arith.constant 0 : index
    %c0_20 = arith.constant 0 : index
    %46 = vector.load %arg5[%c1_18, %c0_19, %c0_20] : memref<3x128x128xbf16, #tpu.memory_space<vmem>>, vector<1x128x128xbf16>
    %47 = vector.shape_cast %46 : vector<1x128x128xbf16> to vector<128x128xbf16>
    %cst_21 = arith.constant dense<0.000000e+00> : vector<8x128xf32>
    %48 = tpu.matmul %45, %47, %cst_21 {dimension_numbers = #tpu.dot_dimension_numbers<[1], [0], [0], [1], [0, 0, 1, 1], [], []>} : vector<8x128xbf16>, vector<128x128xbf16>, vector<8x128xf32> -> vector<8x128xf32>
    %49 = arith.addf %34, %48 : vector<8x128xf32>
    %50 = math.tanh %49 : vector<8x128xf32>
    %cst_22 = arith.constant 1.000000e+00 : f32
    %51 = vector.broadcast %cst_22 : f32 to vector<8x128xf32>
    %52 = arith.subf %51, %42 : vector<8x128xf32>
    %53 = arith.mulf %52, %50 : vector<8x128xf32>
    %54 = arith.mulf %41, %32 : vector<8x128xf32>
    %55 = arith.addf %53, %54 : vector<8x128xf32>
    %56 = vector.extract_strided_slice %6 {offsets = [0, 1152], sizes = [8, 384], strides = [1, 1]} : vector<8x1664xf32> to vector<8x384xf32>
    %57 = vector.extract_strided_slice %6 {offsets = [0, 1536], sizes = [8, 128], strides = [1, 1]} : vector<8x1664xf32> to vector<8x128xf32>
    %58 = arith.truncf %55 : vector<8x128xf32> to vector<8x128xbf16>
    %c2 = arith.constant 2 : index
    %c0_23 = arith.constant 0 : index
    %c0_24 = arith.constant 0 : index
    %59 = vector.load %arg4[%c2, %c0_23, %c0_24] : memref<3x128x384xbf16, #tpu.memory_space<vmem>>, vector<1x128x384xbf16>
    %60 = vector.shape_cast %59 : vector<1x128x384xbf16> to vector<128x384xbf16>
    %cst_25 = arith.constant dense<0.000000e+00> : vector<8x384xf32>
    %61 = tpu.matmul %58, %60, %cst_25 {dimension_numbers = #tpu.dot_dimension_numbers<[1], [0], [0], [1], [0, 0, 1, 1], [], []>} : vector<8x128xbf16>, vector<128x384xbf16>, vector<8x384xf32> -> vector<8x384xf32>
    %62 = arith.addf %56, %61 : vector<8x384xf32>
    %63 = math.tanh %62 : vector<8x384xf32>
    %64 = vector.extract_strided_slice %63 {offsets = [0, 0], sizes = [8, 128], strides = [1, 1]} : vector<8x384xf32> to vector<8x128xf32>
    %65 = vector.extract_strided_slice %63 {offsets = [0, 128], sizes = [8, 128], strides = [1, 1]} : vector<8x384xf32> to vector<8x128xf32>
    %66 = vector.extract_strided_slice %63 {offsets = [0, 256], sizes = [8, 128], strides = [1, 1]} : vector<8x384xf32> to vector<8x128xf32>
    %67 = arith.mulf %55, %66 : vector<8x128xf32>
    %68 = arith.truncf %67 : vector<8x128xf32> to vector<8x128xbf16>
    %c2_26 = arith.constant 2 : index
    %c0_27 = arith.constant 0 : index
    %c0_28 = arith.constant 0 : index
    %69 = vector.load %arg5[%c2_26, %c0_27, %c0_28] : memref<3x128x128xbf16, #tpu.memory_space<vmem>>, vector<1x128x128xbf16>
    %70 = vector.shape_cast %69 : vector<1x128x128xbf16> to vector<128x128xbf16>
    %cst_29 = arith.constant dense<0.000000e+00> : vector<8x128xf32>
    %71 = tpu.matmul %68, %70, %cst_29 {dimension_numbers = #tpu.dot_dimension_numbers<[1], [0], [0], [1], [0, 0, 1, 1], [], []>} : vector<8x128xbf16>, vector<128x128xbf16>, vector<8x128xf32> -> vector<8x128xf32>
    %72 = arith.addf %57, %71 : vector<8x128xf32>
    %73 = math.tanh %72 : vector<8x128xf32>
    %cst_30 = arith.constant 1.000000e+00 : f32
    %74 = vector.broadcast %cst_30 : f32 to vector<8x128xf32>
    %75 = arith.subf %74, %65 : vector<8x128xf32>
    %76 = arith.mulf %75, %73 : vector<8x128xf32>
    %77 = arith.mulf %64, %55 : vector<8x128xf32>
    %78 = arith.addf %76, %77 : vector<8x128xf32>
    %79 = arith.truncf %78 : vector<8x128xf32> to vector<8x128xbf16>
    %c0_31 = arith.constant 0 : index
    %c0_32 = arith.constant 0 : index
    %80 = vector.load %arg6[%c0_31, %c0_32] : memref<128x128xbf16, #tpu.memory_space<vmem>>, vector<128x128xbf16>
    %cst_33 = arith.constant dense<0.000000e+00> : vector<8x128xf32>
    %81 = tpu.matmul %79, %80, %cst_33 {dimension_numbers = #tpu.dot_dimension_numbers<[1], [0], [0], [1], [0, 0, 1, 1], [], []>} : vector<8x128xbf16>, vector<128x128xbf16>, vector<8x128xf32> -> vector<8x128xf32>
    %c0_34 = arith.constant 0 : index
    %c0_35 = arith.constant 0 : index
    %82 = vector.load %arg7[%c0_34, %c0_35] : memref<1x128xf32, #tpu.memory_space<vmem>>, vector<1x128xf32>
    %83 = vector.broadcast %82 : vector<1x128xf32> to vector<8x128xf32>
    %84 = arith.addf %81, %83 : vector<8x128xf32>
    %c0_36 = arith.constant 0 : index
    %c0_37 = arith.constant 0 : index
    %85 = vector.load %arg8[%c0_36, %c0_37] : memref<8x128xf32, #tpu.memory_space<vmem>>, vector<8x128xf32>
    tpu.vector_store %arg8[%c0_36, %c0_37], %84 {strides = array<i32>} : memref<8x128xf32, #tpu.memory_space<vmem>>, vector<8x128xf32>,
    return
  }
  func.func @transform_0(%arg0: i32) -> (i32, i32) {
    %c0_i32 = arith.constant 0 : i32
    %c0_i32_0 = arith.constant 0 : i32
    return %arg0, %c0_i32 : i32, i32
  }
  func.func @transform_1(%arg0: i32) -> (i32, i32) {
    %c0_i32 = arith.constant 0 : i32
    %c0_i32_0 = arith.constant 0 : i32
    %c0_i32_1 = arith.constant 0 : i32
    return %c0_i32, %c0_i32_0 : i32, i32
  }
  func.func @transform_2(%arg0: i32) -> (i32, i32) {
    %c0_i32 = arith.constant 0 : i32
    %c0_i32_0 = arith.constant 0 : i32
    %c0_i32_1 = arith.constant 0 : i32
    return %c0_i32, %c0_i32_0 : i32, i32
  }
  func.func @transform_3(%arg0: i32) -> (i32, i32, i32) {
    %c0_i32 = arith.constant 0 : i32
    %c0_i32_0 = arith.constant 0 : i32
    %c0_i32_1 = arith.constant 0 : i32
    %c0_i32_2 = arith.constant 0 : i32
    return %c0_i32, %c0_i32_0, %c0_i32_1 : i32, i32, i32
  }
  func.func @transform_4(%arg0: i32) -> (i32, i32, i32) {
    %c0_i32 = arith.constant 0 : i32
    %c0_i32_0 = arith.constant 0 : i32
    %c0_i32_1 = arith.constant 0 : i32
    %c0_i32_2 = arith.constant 0 : i32
    return %c0_i32, %c0_i32_0, %c0_i32_1 : i32, i32, i32
  }
  func.func @transform_5(%arg0: i32) -> (i32, i32) {
    %c0_i32 = arith.constant 0 : i32
    %c0_i32_0 = arith.constant 0 : i32
    %c0_i32_1 = arith.constant 0 : i32
    return %c0_i32, %c0_i32_0 : i32, i32
  }
  func.func @transform_6(%arg0: i32) -> (i32, i32) {
    %c0_i32 = arith.constant 0 : i32
    %c0_i32_0 = arith.constant 0 : i32
    %c0_i32_1 = arith.constant 0 : i32
    return %c0_i32, %c0_i32_0 : i32, i32
  }
  func.func @transform_7(%arg0: i32) -> (i32, i32) {
    %c0_i32 = arith.constant 0 : i32
    %c0_i32_0 = arith.constant 0 : i32
    return %arg0, %c0_i32 : i32, i32
  }
}

</mosaic_0001>

<bundles_post_ra>
// kernel: tpu_custom_call.1
= control target key start
LH: loop header
LB: loop body
LE: loop exit
PB: predicated region body
PF: predicated region fallthrough
CT: control target
= control target key end

     0   :  { %12 = vsyncpa [#allocation3], 0  ;;  %s2704_s0 = inlined_call_operand.vmem [shape: f32[8,4], index: 0, kind: input, shape index: {}]   ;;  %s2705_s1 = inlined_call_operand.hbm [shape: bf16[4,1664], index: 1, kind: input, shape index: {}]   ;;  %s2706_s2 = inlined_call_operand.vmem [shape: f32[1,1664], index: 2, kind: input, shape index: {}]   ;;  %s2707_s3 = inlined_call_operand.hbm [shape: bf16[3,128,384], index: 3, kind: input, shape index: {}]   ;;  %s2708_s4 = inlined_call_operand.hbm [shape: bf16[3,128,128], index: 4, kind: input, shape index: {}]   ;;  %s2709_s5 = inlined_call_operand.hbm [shape: bf16[128,128], index: 5, kind: input, shape index: {}]   ;;  %s2710_s6 = inlined_call_operand.vmem [shape: f32[1,128], index: 6, kind: input, shape index: {}]   ;;  %s2711_s7 = inlined_call_operand.hbm [shape: f32[8,128], index: 7, kind: output, shape index: {}]  }
   0x1   :  { %13 = vsyncpa [#allocation6], 0 }
   0x2   :  { %14 = vsyncpa [#allocation9], 0 }
   0x3   :  { %15 = vsyncpa [#allocation4], 0  ;;  %s2384_s24 = smov [#allocation5]   ;;  %s2266_s28 = scalar_lea.hbm %s2707_s3, 9216 }
   0x4   :  { %s35_s25 = sshll.u32 %s2384_s24, 4  ;;  %p2267_p0 = scmp.ne.s32.totalorder %s2707_s3, %s2266_s28  ;;  %s36_s25 = int_to_ptr.vmem [resolvable:$true] %s35_s25 }
   0x5   :  { %p2270_p1 = scmp.lt.u32.totalorder %s2266_s28, %s2707_s3 }
   0x7   :  { %p2272_p2 = pnand %p2270_p1, %p2267_p0 }
   0x9   :  { %2275 = shalt.err (!%p2272_p2)
}
   0xa   :  { %s2276_s10 = scalar_lea.vmem %s36_s25, 9216  ;;  %p2281_p4 = scmp.lt.s32.totalorder %s36_s25, %s36_s25 }
   0xb   :  { %p2277_p3 = scmp.ne.s32.totalorder %s36_s25, %s2276_s10  ;;  %p2282_p5 = scmp.lt.s32.totalorder %s2276_s10, %s2276_s10 }
   0xd   :  { %p2283_p6 = por %p2282_p5, %p2281_p4 }
   0xf   :  { %p2284_p7 = pnand %p2283_p6, %p2277_p3 }
  0x11   :  { %2287 = shalt.err (!%p2284_p7)
}
  0x12   :  { %s2385_s11 = smov 192   ;;  %s2386_s12 = smov 12  }
  0x13   :  { %41 = dma.hbm_to_vmem [thread:$0]  %s2707_s3, 9216, %s36_s25, [#allocation6], %s2385_s11, %s2385_s11, %s2386_s12  }
  0x14   :  { %s2387_s15 = smov [#allocation2]   ;;  %s2388_s17 = smov [#allocation7]  }
  0x15   :  { %s24_s16 = sshll.u32 %s2387_s15, 4  ;;  %s47_s18 = sshll.u32 %s2388_s17, 4  ;;  %s25_s16 = int_to_ptr.vmem [resolvable:$true] %s24_s16  ;;  %s48_s18 = int_to_ptr.vmem [resolvable:$true] %s47_s18 }
  0x16   :  { %s2288_s21 = scalar_lea.hbm %s2705_s1, 416 }
  0x17   :  { %p2289_p8 = scmp.ne.s32.totalorder %s2705_s1, %s2288_s21  ;;  %p2292_p9 = scmp.lt.u32.totalorder %s2288_s21, %s2705_s1 }
  0x19   :  { %p2294_p10 = pnand %p2292_p9, %p2289_p8 }
  0x1b   :  { %2297 = shalt.err (!%p2294_p10)
}
  0x1c   :  { %s2298_s3 = scalar_lea.vmem %s25_s16, 416  ;;  %p2303_p12 = scmp.lt.s32.totalorder %s25_s16, %s25_s16 }
  0x1d   :  { %p2299_p11 = scmp.ne.s32.totalorder %s25_s16, %s2298_s3  ;;  %p2304_p13 = scmp.lt.s32.totalorder %s2298_s3, %s2298_s3 }
  0x1f   :  { %p2305_p0 = por %p2304_p13, %p2303_p12 }
  0x21   :  { %p2306_p1 = pnand %p2305_p0, %p2299_p11 }
  0x23   :  { %2309 = shalt.err (!%p2306_p1)
}
  0x24   :  { %27 = dma.hbm_to_vmem [thread:$0]  %s2705_s1, 416, %s25_s16, [#allocation3]  }
  0x25   :  { %s2310_s30 = scalar_lea.hbm %s2708_s4, 3072 }
  0x26   :  { %p2311_p2 = scmp.ne.s32.totalorder %s2708_s4, %s2310_s30  ;;  %p2314_p3 = scmp.lt.u32.totalorder %s2310_s30, %s2708_s4 }
  0x28   :  { %p2316_p4 = pnand %p2314_p3, %p2311_p2 }
  0x2a   :  { %2319 = shalt.err (!%p2316_p4)
}
  0x2b   :  { %s2320_s12 = scalar_lea.vmem %s48_s18, 3072  ;;  %p2325_p6 = scmp.lt.s32.totalorder %s48_s18, %s48_s18 }
  0x2c   :  { %p2321_p5 = scmp.ne.s32.totalorder %s48_s18, %s2320_s12  ;;  %p2326_p7 = scmp.lt.s32.totalorder %s2320_s12, %s2320_s12 }
  0x2e   :  { %p2327_p8 = por %p2326_p7, %p2325_p6 }
  0x30   :  { %p2328_p9 = pnand %p2327_p8, %p2321_p5 }
  0x32   :  { %2331 = shalt.err (!%p2328_p9)
}
  0x33   :  { %s2389_s1 = smov 64   ;;  %s2390_s13 = smov 4  }
  0x34   :  { %53 = dma.hbm_to_vmem [thread:$0]  %s2708_s4, 3072, %s48_s18, [#allocation6], %s2389_s1, %s2389_s1, %s2390_s13  }
  0x35   :  { %s2391_s16 = smov [#allocation8]   ;;  %s2332_s21 = scalar_lea.hbm %s2709_s5, 1024 }
  0x36   :  { %s59_s17 = sshll.u32 %s2391_s16, 4  ;;  %p2333_p10 = scmp.ne.s32.totalorder %s2709_s5, %s2332_s21  ;;  %s60_s17 = int_to_ptr.vmem [resolvable:$true] %s59_s17 }
  0x37   :  { %p2336_p11 = scmp.lt.u32.totalorder %s2332_s21, %s2709_s5 }
  0x39   :  { %p2338_p12 = pnand %p2336_p11, %p2333_p10 }
  0x3b   :  { %2341 = shalt.err (!%p2338_p12)
}
  0x3c   :  { %s2342_s3 = scalar_lea.vmem %s60_s17, 1024  ;;  %p2347_p0 = scmp.lt.s32.totalorder %s60_s17, %s60_s17 }
  0x3d   :  { %p2343_p13 = scmp.ne.s32.totalorder %s60_s17, %s2342_s3  ;;  %p2348_p1 = scmp.lt.s32.totalorder %s2342_s3, %s2342_s3 }
  0x3f   :  { %p2349_p2 = por %p2348_p1, %p2347_p0 }
  0x41   :  { %p2350_p3 = pnand %p2349_p2, %p2343_p13 }
  0x43   :  { %2353 = shalt.err (!%p2350_p3)
}
  0x44   :  { %65 = dma.hbm_to_vmem [thread:$0]  %s2709_s5, 1024, %s60_s17, [#allocation9], %s2389_s1, %s2389_s1, %s2390_s13  }
  0x45   :  { %2376 = dma.done.wait [#allocation3], 416  }
  0x46   :  { %2377 = vsyncadd [#allocation3], 4294966880 }
  0x47   :  { %2378 = dma.done.wait [#allocation6], 12288  }
  0x48   :  { %2379 = vsyncadd [#allocation6], 4294955008 }
  0x49   :  { %2380 = dma.done.wait [#allocation9], 1024  }
  0x4a   :  { %2381 = vsyncadd [#allocation9], 4294966272  ;;  %v91_v0 = vlaneseq  ;;  %v2392_v1 = vmov 1983009808   ;;  %v2393_v3 = vmov 0   ;;  %v83_v7 = vld [vmem:[#allocation2] sm:$0xff] }
  0x4b   :  { %v162_v2 = vunpack.c.l.s4 %v2392_v1  ;;  %294 = vmatprep.mubr.bf16.mxu0 %v2393_v3  ;;  %335 = vmatprep.mubr.bf16.mxu1 %v2393_v3  ;;  %vm222_vm0 = vcmask 1041408   ;;  %v84_v8 = vld [vmem:[#allocation2 + $0x8] sm:$0xff]  ;;  %v160_v11 = vcombine.high %v83_v7, %v83_v7  ;;  %v85_v12 = vld [vmem:[#allocation2 + $0x10] sm:$0xff]  ;;  %vm218_vm1 = vcmask 31744   ;;  %s2396_s8 = smov [#allocation10]  }
  0x4c   :  { %v2487_v4 = vshrl.u32 %v91_v0, 7  ;;  %v81_v13 = vld [vmem:[%s2704_s0] sm:$0xff]  ;;  %v177_v14 = vcombine.high %v84_v8, %v84_v8  ;;  %v194_v15 = vcombine.high %v85_v12, %v85_v12  ;;  %v1763_v32 = vld.sshfl [vmem:[#allocation2 + $0x18] sm:$0x3 pattern:$0x76325410] }
  0x4d   :  { %v163_v5 = vunpack.c.0.s8 %v162_v2  ;;  %v82_v22 = vpack.c.bf16 %v81_v13, %v81_v13  ;;  %v2116_v33 = vld [vmem:[#allocation5 + $0x4] ss:$12 sps:$4 sm:$0xff]   ;;  %v2394_v35 = vmov 0.0   ;;  %v260_v36 = vsel %vm222_vm0, %v1763_v32, 0  ;;  %v2114_v37 = vld [vmem:[#allocation5] ss:$12 sps:$4 sm:$0xff]  }
  0x4e   :  { %v2120_v38 = vld [vmem:[#allocation5 + $0x1c] ss:$12 sps:$4 sm:$0xff]   ;;  %vm2395_vm2 = vmmov 0   ;;  %v2118_v39 = vld [vmem:[#allocation5 + $0x18] ss:$12 sps:$4 sm:$0xff]   ;;  %v93_v60 = vsub.s32 0, %v2487_v4 }
  0x4f   :  { %v166_v6 = vsub.s32 %v163_v5, %v2487_v4  ;;  %v2117_v40 = vld [vmem:[#allocation5 + $0x8] ss:$12 sps:$4 sm:$0xff]   ;;  %v2122_v42 = vld [vmem:[#allocation5 + $0x30] ss:$12 sps:$4 sm:$0xff]   ;;  %v2121_v43 = vld [vmem:[#allocation5 + $0x20] ss:$12 sps:$4 sm:$0xff]  }
  0x50   :  { %v2124_v41 = vld [vmem:[#allocation5 + $0x34] ss:$12 sps:$4 sm:$0xff]   ;;  %v2128_v44 = vld [vmem:[#allocation5 + $0x4c] ss:$12 sps:$4 sm:$0xff]   ;;  %v2132_v47 = vld [vmem:[#allocation5 + $0x64] ss:$12 sps:$4 sm:$0xff]  }
  0x51   :  { %v167_v9 = vrot.slane %v83_v7, %v166_v6  ;;  %v184_v10 = vrot.slane %v84_v8, %v166_v6  ;;  %v201_v19 = vrot.slane %v85_v12, %v166_v6  ;;  %v174_v20 = vrot.slane %v160_v11, %v166_v6  ;;  %v2126_v45 = vld [vmem:[#allocation5 + $0x48] ss:$12 sps:$4 sm:$0xff]   ;;  %v2125_v46 = vld [vmem:[#allocation5 + $0x38] ss:$12 sps:$4 sm:$0xff]   ;;  %v2130_v48 = vld [vmem:[#allocation5 + $0x60] ss:$12 sps:$4 sm:$0xff]  }
  0x52   :  { %v191_v21 = vrot.slane %v177_v14, %v166_v6  ;;  %v208_v25 = vrot.slane %v194_v15, %v166_v6  ;;  %v2129_v49 = vld [vmem:[#allocation5 + $0x50] ss:$12 sps:$4 sm:$0xff]   ;;  %v2134_v51 = vld [vmem:[#allocation5 + $0x78] ss:$12 sps:$4 sm:$0xff]   ;;  %v2133_v52 = vld [vmem:[#allocation5 + $0x68] ss:$12 sps:$4 sm:$0xff]  }
  0x53   :  { %v175_v16 = vcombine.high %v167_v9, %v167_v9  ;;  %v224_v17 = vsel %vm222_vm0, %v167_v9, 0  ;;  %v192_v18 = vcombine.high %v184_v10, %v184_v10  ;;  %v176_v23 = vcombine.high %v174_v20, %v174_v20  ;;  %v2136_v50 = vld [vmem:[#allocation5 + $0x7c] ss:$12 sps:$4 sm:$0xff]   ;;  %v2140_v53 = vld [vmem:[#allocation5 + $0x94] ss:$12 sps:$4 sm:$0xff]   ;;  %s1752_s9 = sshll.u32 %s2396_s8, 4  ;;  %s1753_s9 = int_to_ptr.vmem [resolvable:$true] %s1752_s9 }
  0x54   :  { %v230_v24 = vsel %vm222_vm0, %v174_v20, 0  ;;  %v236_v26 = vsel %vm222_vm0, %v184_v10, 0  ;;  %v209_v27 = vcombine.high %v201_v19, %v201_v19  ;;  %v193_v28 = vcombine.high %v191_v21, %v191_v21  ;;  %v2138_v54 = vld [vmem:[#allocation5 + $0x90] ss:$12 sps:$4 sm:$0xff]   ;;  %v2137_v55 = vld [vmem:[#allocation5 + $0x80] ss:$12 sps:$4 sm:$0xff]   ;;  %p2359_p5 = scmp.lt.s32.totalorder %s1753_s9, %s1753_s9 }
  0x55   :  { %1764 = vmatprep.subr.msk.bf16.mxu0 %vm222_vm0, %v175_v16  ;;  %1766 = vmatprep.subr.msk.bf16.mxu1 %vm222_vm0, %v176_v23  ;;  %v242_v29 = vsel %vm222_vm0, %v191_v21, 0  ;;  %v210_v30 = vcombine.high %v208_v25, %v208_v25  ;;  %v248_v31 = vsel %vm222_vm0, %v201_v19, 0  ;;  %v254_v34 = vsel %vm222_vm0, %v208_v25, 0  ;;  %v2141_v56 = vld [vmem:[#allocation5 + $0x98] ss:$12 sps:$4 sm:$0xff]   ;;  %v2147_v14 = vld [vmem:[#allocation7 + $0x8] sm:$0xff]  }
  0x56   :  { %263 = vmatpush1.bf16.msra.mxu0 %v224_v17  ;;  %304 = vmatpush1.bf16.msra.mxu1 %v230_v24  ;;  %v2144_v57 = vld [vmem:[#allocation5 + $0xac] ss:$12 sps:$4 sm:$0xff]   ;;  %v2142_v58 = vld [vmem:[#allocation5 + $0xa8] ss:$12 sps:$4 sm:$0xff]   ;;  %v2145_v59 = vld [vmem:[#allocation5 + $0xb0] ss:$12 sps:$4 sm:$0xff]  }
  0x57   :  { %1768 = vmatprep.subr.msk.bf16.mxu0 %vm222_vm0, %v192_v18  ;;  %1770 = vmatprep.subr.msk.bf16.mxu1 %vm222_vm0, %v193_v28  ;;  %v2536_v61 = vld [vmem:[%s2706_s2] sm:$0xff]  ;;  %v2146_v8 = vld [vmem:[#allocation7] sm:$0xff]   ;;  %v97_v20 = vsub.s32 1, %v2487_v4  ;;  %v101_v25 = vsub.s32 2, %v2487_v4  ;;  %s2354_s10 = scalar_lea.vmem %s1753_s9, 128 }
  0x58   :  { %v94_v62 = vrot.slane %v2536_v61, %v93_v60  ;;  %v2562_v18 = vld [vmem:[%s2706_s2 + $0x8] sm:$0x1f]  ;;  %p2355_p4 = scmp.ne.s32.totalorder %s1753_s9, %s2354_s10  ;;  %p2360_p6 = scmp.lt.s32.totalorder %s2354_s10, %s2354_s10 }
  0x59   :  { %1765 = vmatmul.mubr.msk.bf16.vlgmr.msra.gmra.mrb[0].mxu0 %vm218_vm1, %v82_v22  ;;  %1767 = vmatmul.mubr.msk.bf16.vlgmr.msra.gmra.mrb[0].mxu1 %vm218_vm1, %v82_v22  ;;  %v130_v24 = vrot.slane %v2562_v18, %v97_v20 }
  0x5a   :  { %345 = vmatpush1.bf16.msra.mxu0 %v236_v26  ;;  %376 = vmatprep.mubr.bf16.mxu0 %v2393_v3  ;;  %p2361_p7 = por %p2360_p6, %p2359_p5 }
  0x5b   :  { %1772 = vmatprep.subr.msk.bf16.mxu0 %vm222_vm0, %v209_v27  ;;  %386 = vmatpush1.bf16.msra.mxu1 %v242_v29  ;;  %v105_v27 = vsub.s32 3, %v2487_v4  ;;  %v134_v29 = vrot.slane %v2562_v18, %v101_v25 }
  0x5c   :  { %417 = vmatprep.mubr.bf16.mxu1 %v2393_v3  ;;  %1774 = vmatprep.subr.msk.bf16.mxu1 %vm222_vm0, %v210_v30  ;;  %v2149_v30 = vld [vmem:[#allocation7 + $0x18] sm:$0xff]   ;;  %p2362_p8 = pnand %p2361_p7, %p2355_p4 }
  0x5d   :  { %v138_v32 = vrot.slane %v2562_v18, %v105_v27 }
  0x61   :  { %1769 = vmatmul.mubr.msk.bf16.vlgmr.msra.gmra.mrb[4].mxu0 %vm218_vm1, %v82_v22  ;;  %1771 = vmatmul.mubr.msk.bf16.vlgmr.msra.gmra.mrb[4].mxu1 %vm218_vm1, %v82_v22 }
  0x62   :  { %427 = vmatpush1.bf16.msra.mxu0 %v248_v31  ;;  %458 = vmatprep.mubr.bf16.mxu0 %v2393_v3 }
  0x63   :  { %1947 = vmatprep.subr.bf16.mxu0 %v2394_v35  ;;  %468 = vmatpush1.bf16.msra.mxu1 %v254_v34 }
  0x64   :  { %499 = vmatprep.mubr.bf16.mxu1 %v2393_v3  ;;  %710 = vmatprep.subr.bf16.mxu1 %v2116_v33 }
  0x69   :  { %1773 = vmatmul.mubr.msk.bf16.vlgmr.msra.gmra.mrb[8].mxu0 %vm218_vm1, %v82_v22  ;;  %1775 = vmatmul.mubr.msk.bf16.vlgmr.msra.gmra.mrb[8].mxu1 %vm218_vm1, %v82_v22 }
  0x6a   :  { %1948 = vmatpush3.bf16.msra.mxu0 %v260_v36  ;;  %1949 = vmatprep.mubr.msk.bf16.mxu0 %vm2395_vm2, %v2394_v35 }
  0x6b   :  { %1953 = vmatprep.subr.bf16.mxu0 %v2394_v35  ;;  %711 = vmatpush1.bf16.msra.mxu1 %v2114_v37 }
  0x6c   :  { %742 = vmatprep.mubr.bf16.mxu1 %v2393_v3  ;;  %712 = vmatprep.subr.bf16.mxu1 %v2120_v38 }
  0x6f   :  { %713 = vmatpush1.bf16.msra.mxu1 %v2118_v39 }
  0x70   :  { %714 = vmatprep.subr.bf16.mxu1 %v2124_v41 }
  0x71   :  { %1950 = vmatmul.mubr.msk.bf16.vlgmr.msra.gmra.mrb[12].mxu0 %vm218_vm1, %v82_v22  ;;  %v2148_v22 = vld [vmem:[#allocation7 + $0x10] sm:$0xff]  }
  0x72   :  { %1954 = vmatpush3.bf16.msra.mxu0 %v2117_v40  ;;  %1969 = vmatprep.mubr.msk.bf16.mxu0 %vm2395_vm2, %v2394_v35 }
  0x73   :  { %1955 = vmatprep.subr.bf16.mxu0 %v2394_v35  ;;  %715 = vmatpush1.bf16.msra.mxu1 %v2122_v42 }
  0x74   :  { %716 = vmatprep.subr.bf16.mxu1 %v2128_v44  ;;  %v2151_v44 = vld [vmem:[#allocation7 + $0x28] sm:$0xff]  }
  0x76   :  { %1956 = vmatpush3.bf16.msra.mxu0 %v2121_v43  ;;  %v2150_v43 = vld [vmem:[#allocation7 + $0x20] sm:$0xff]  }
  0x77   :  { %1957 = vmatprep.subr.bf16.mxu0 %v2394_v35  ;;  %717 = vmatpush1.bf16.msra.mxu1 %v2126_v45  ;;  %v2152_v45 = vld [vmem:[#allocation7 + $0x30] sm:$0xff]  }
  0x78   :  { %718 = vmatprep.subr.bf16.mxu1 %v2132_v47  ;;  %v2154_v47 = vld [vmem:[#allocation5 + $0xc0] ss:$12 sps:$4 sm:$0xff]  }
  0x7a   :  { %1958 = vmatpush3.bf16.msra.mxu0 %v2125_v46  ;;  %v2153_v46 = vld [vmem:[#allocation7 + $0x38] sm:$0xff]  }
  0x7b   :  { %1959 = vmatprep.subr.bf16.mxu0 %v2394_v35  ;;  %719 = vmatpush1.bf16.msra.mxu1 %v2130_v48  ;;  %v2156_v48 = vld [vmem:[#allocation5 + $0xc4] ss:$12 sps:$4 sm:$0xff]  }
  0x7c   :  { %720 = vmatprep.subr.bf16.mxu1 %v2136_v50  ;;  %v2158_v50 = vld [vmem:[#allocation5 + $0xd8] ss:$12 sps:$4 sm:$0xff]  }
  0x7e   :  { %1960 = vmatpush3.bf16.msra.mxu0 %v2129_v49  ;;  %v2160_v49 = vld [vmem:[#allocation5 + $0xdc] ss:$12 sps:$4 sm:$0xff]  }
  0x7f   :  { %1961 = vmatprep.subr.bf16.mxu0 %v2394_v35  ;;  %721 = vmatpush1.bf16.msra.mxu1 %v2134_v51  ;;  %v2164_v51 = vld [vmem:[#allocation5 + $0xf4] ss:$12 sps:$4 sm:$0xff]  }
  0x80   :  { %722 = vmatprep.subr.bf16.mxu1 %v2140_v53  ;;  %v106_v53 = vrot.slane %v2536_v61, %v105_v27  ;;  %v2173_v27 = vld [vmem:[#allocation5 + $0x128] ss:$12 sps:$4 sm:$0xff]  }
  0x82   :  { %1962 = vmatpush3.bf16.msra.mxu0 %v2133_v52  ;;  %v2162_v52 = vld [vmem:[#allocation5 + $0xf0] ss:$12 sps:$4 sm:$0xff]  }
  0x83   :  { %1963 = vmatprep.subr.bf16.mxu0 %v2394_v35  ;;  %723 = vmatpush1.bf16.msra.mxu1 %v2138_v54  ;;  %v98_v54 = vrot.slane %v2536_v61, %v97_v20  ;;  %v2165_v20 = vld [vmem:[#allocation5 + $0xf8] ss:$12 sps:$4 sm:$0xff]  }
  0x84   :  { %724 = vmatprep.subr.bf16.mxu1 %v2144_v57 }
  0x86   :  { %1964 = vmatpush3.bf16.msra.mxu0 %v2137_v55  ;;  %v102_v55 = vrot.slane %v2536_v61, %v101_v25  ;;  %v2172_v25 = vld [vmem:[#allocation5 + $0x124] ss:$12 sps:$4 sm:$0xff]  }
  0x87   :  { %1965 = vmatprep.subr.bf16.mxu0 %v2394_v35  ;;  %725 = vmatpush1.bf16.msra.mxu1 %v2142_v58 }
  0x88   :  { %1973 = vmatprep.subr.bf16.mxu1 %v2394_v35 }
  0x8a   :  { %1966 = vmatpush3.bf16.msra.mxu0 %v2141_v56 }
  0x8b   :  { %1967 = vmatprep.subr.bf16.mxu0 %v2394_v35 }
  0x8e   :  { %1968 = vmatpush3.bf16.msra.mxu0 %v2145_v59 }
  0x8f   :  { %1071 = vmatprep.subr.bf16.mxu0 %v2156_v48 }
 0x12c   :  { %v296_v63 = vpop.f32.mrb[0].mxu0  ;;  %v2545_v7 = vpop.f32.mrb[0].mxu1 }
 0x12d   :  { %v297_v0 = vadd.f32 %v296_v63, %v94_v62  ;;  %v2541_v1 = vpop.f32.mrb[1].mxu0  ;;  %v2547_v9 = vpop.f32.mrb[1].mxu1  ;;  %v338_v58 = vadd.f32 %v2545_v7, %v102_v55  ;;  %v2161_v7 = vld [vmem:[#allocation5 + $0xe0] ss:$12 sps:$4 sm:$0xff]  }
 0x12e   :  { %v300_v2 = vpop.f32.mrb[2].mxu0  ;;  %v341_v11 = vpop.f32.mrb[2].mxu1  ;;  %v340_v56 = vadd.f32 %v2547_v9, %v106_v53  ;;  %v299_v57 = vadd.f32 %v2541_v1, %v98_v54 }
 0x12f   :  { %v2543_v5 = vmax.f32 %v297_v0, 0.0  ;;  %v301_v6 = vpop.f32.mrb[3].mxu0  ;;  %v342_v12 = vpop.f32.mrb[3].mxu1 }
 0x131   :  { %v549_v10 = vpack.c.bf16 %v2543_v5, %v2543_v5 }
 0x133   :  { %743 = vmatmul.mubr.bf16.vlgmr.msra.gmra.mrb[12].mxu1 %v549_v10  ;;  %1970 = vmatmul.mubr.bf16.vlgmr.msra.gmra.mrb[16].mxu0 %v549_v10 }
 0x134   :  { %v2551_v13 = vpop.f32.mrb[4].mxu0  ;;  %1974 = vmatpush3.bf16.msra.mxu1 %v2146_v8  ;;  %1989 = vmatprep.mubr.msk.bf16.mxu1 %vm2395_vm2, %v2394_v35  ;;  %v2564_v19 = vpop.f32.mrb[4].mxu1 }
 0x135   :  { %v2555_v15 = vpop.f32.mrb[5].mxu0  ;;  %1975 = vmatprep.subr.bf16.mxu1 %v2394_v35  ;;  %1103 = vmatprep.mubr.bf16.mxu0 %v2393_v3  ;;  %v2567_v21 = vpop.f32.mrb[5].mxu1 }
 0x136   :  { %v382_v16 = vpop.f32.mrb[6].mxu0  ;;  %v423_v23 = vpop.f32.mrb[6].mxu1  ;;  %1072 = vmatpush1.bf16.msra.mxu0 %v2154_v47 }
 0x137   :  { %v383_v17 = vpop.f32.mrb[7].mxu0  ;;  %v424_v26 = vpop.f32.mrb[7].mxu1  ;;  %1073 = vmatprep.subr.bf16.mxu0 %v2160_v49  ;;  %v2166_v23 = vld [vmem:[#allocation5 + $0x108] ss:$12 sps:$4 sm:$0xff]  }
 0x138   :  { %1976 = vmatpush3.bf16.msra.mxu1 %v2147_v14  ;;  %v2157_v17 = vld [vmem:[#allocation5 + $0xc8] ss:$12 sps:$4 sm:$0xff]   ;;  %v2170_v26 = vld [vmem:[#allocation5 + $0x120] ss:$12 sps:$4 sm:$0xff]  }
 0x139   :  { %1977 = vmatprep.subr.bf16.mxu1 %v2394_v35 }
 0x13a   :  { %1074 = vmatpush1.bf16.msra.mxu0 %v2158_v50 }
 0x13b   :  { %1075 = vmatprep.subr.bf16.mxu0 %v2164_v51 }
 0x13c   :  { %v2573_v28 = vpop.f32.mrb[8].mxu0  ;;  %1978 = vmatpush3.bf16.msra.mxu1 %v2148_v22  ;;  %v501_v37 = vpop.f32.mrb[8].mxu1  ;;  %v2168_v22 = vld [vmem:[#allocation5 + $0x10c] ss:$12 sps:$4 sm:$0xff]  }
 0x13d   :  { %v462_v31 = vpop.f32.mrb[9].mxu0  ;;  %1979 = vmatprep.subr.bf16.mxu1 %v2394_v35  ;;  %v2580_v38 = vadd.f32 %v501_v37, %v134_v29  ;;  %v503_v39 = vpop.f32.mrb[9].mxu1  ;;  %v2176_v29 = vld [vmem:[#allocation5 + $0x13c] ss:$12 sps:$4 sm:$0xff]  }
 0x13e   :  { %v2578_v33 = vadd.f32 %v462_v31, %v130_v24  ;;  %v464_v34 = vpop.f32.mrb[10].mxu0  ;;  %v2582_v40 = vadd.f32 %v503_v39, %v138_v32  ;;  %v505_v41 = vpop.f32.mrb[10].mxu1  ;;  %1076 = vmatpush1.bf16.msra.mxu0 %v2162_v52  ;;  %v2169_v24 = vld [vmem:[#allocation5 + $0x110] ss:$12 sps:$4 sm:$0xff]   ;;  %v2177_v31 = vld [vmem:[#allocation5 + $0x140] ss:$12 sps:$4 sm:$0xff]  }
 0x13f   :  { %v465_v36 = vpop.f32.mrb[11].mxu0  ;;  %v506_v42 = vpop.f32.mrb[11].mxu1  ;;  %1077 = vmatprep.subr.bf16.mxu0 %v2168_v22  ;;  %v2180_v32 = vld [vmem:[#allocation5 + $0x154] ss:$12 sps:$4 sm:$0xff]   ;;  %v2178_v34 = vld [vmem:[#allocation5 + $0x150] ss:$12 sps:$4 sm:$0xff]  }
 0x140   :  { %1980 = vmatpush3.bf16.msra.mxu1 %v2149_v30  ;;  %v2174_v30 = vld [vmem:[#allocation5 + $0x138] ss:$12 sps:$4 sm:$0xff]   ;;  %v2182_v37 = vld [vmem:[#allocation5 + $0x168] ss:$12 sps:$4 sm:$0xff]   ;;  %v2185_v41 = vld [vmem:[#allocation5 + $0x170] ss:$12 sps:$4 sm:$0xff]  }
 0x141   :  { %1981 = vmatprep.subr.bf16.mxu1 %v2394_v35  ;;  %v2181_v36 = vld [vmem:[#allocation5 + $0x158] ss:$12 sps:$4 sm:$0xff]   ;;  %v109_v42 = vsub.s32 4, %v2487_v4 }
 0x142   :  { %1078 = vmatpush1.bf16.msra.mxu0 %v2166_v23  ;;  %v2184_v39 = vld [vmem:[#allocation5 + $0x16c] ss:$12 sps:$4 sm:$0xff]  }
 0x143   :  { %1079 = vmatprep.subr.bf16.mxu0 %v2172_v25 }
 0x144   :  { %1982 = vmatpush3.bf16.msra.mxu1 %v2150_v43  ;;  %v110_v43 = vrot.slane %v2536_v61, %v109_v42 }
 0x145   :  { %1983 = vmatprep.subr.bf16.mxu1 %v2394_v35 }
 0x146   :  { %1080 = vmatpush1.bf16.msra.mxu0 %v2170_v26 }
 0x147   :  { %1081 = vmatprep.subr.bf16.mxu0 %v2176_v29 }
 0x148   :  { %1984 = vmatpush3.bf16.msra.mxu1 %v2151_v44  ;;  %v379_v44 = vadd.f32 %v2551_v13, %v110_v43  ;;  %v2208_v43 = vld [vmem:[#allocation5 + $0x1cc] ss:$12 sps:$4 sm:$0xff]  }
 0x149   :  { %1985 = vmatprep.subr.bf16.mxu1 %v2394_v35 }
 0x14a   :  { %1082 = vmatpush1.bf16.msra.mxu0 %v2174_v30 }
 0x14b   :  { %1083 = vmatprep.subr.bf16.mxu0 %v2180_v32 }
 0x14c   :  { %1986 = vmatpush3.bf16.msra.mxu1 %v2152_v45 }
 0x14d   :  { %1987 = vmatprep.subr.bf16.mxu1 %v2394_v35 }
 0x14e   :  { %1084 = vmatpush1.bf16.msra.mxu0 %v2178_v34 }
 0x14f   :  { %1085 = vmatprep.subr.bf16.mxu0 %v2184_v39  ;;  %v2197_v39 = vld [vmem:[#allocation5 + $0x188] ss:$12 sps:$4 sm:$0xff]  }
 0x150   :  { %1988 = vmatpush3.bf16.msra.mxu1 %v2153_v46 }
 0x151   :  { %1993 = vmatprep.subr.bf16.mxu1 %v2394_v35 }
 0x152   :  { %1086 = vmatpush1.bf16.msra.mxu0 %v2182_v37 }
 0x153   :  { %2013 = vmatprep.subr.bf16.mxu0 %v2394_v35 }
 0x206   :  { %v744_v59 = vpop.f32.mrb[12].mxu1  ;;  %v785_v62 = vpop.f32.mrb[16].mxu0 }
 0x207   :  { %v2595_v63 = vadd.f32 %v744_v59, %v299_v57  ;;  %v793_v0 = vadd.f32 %v785_v62, %v340_v56  ;;  %v746_v2 = vpop.f32.mrb[13].mxu1  ;;  %v1971_v6 = vpop.f32.mrb[17].mxu0  ;;  %v2186_v57 = vld [vmem:[#allocation7 + $0x40] sm:$0xff]   ;;  %v2189_v59 = vld [vmem:[#allocation7 + $0x58] sm:$0xff]  }
 0x208   :  { %v792_v8 = vadd.f32 %v746_v2, %v338_v58  ;;  %v748_v10 = vpop.f32.mrb[14].mxu1  ;;  %v788_v11 = vpop.f32.mrb[18].mxu0  ;;  %v2187_v58 = vld [vmem:[#allocation7 + $0x48] sm:$0xff]   ;;  %v2190_v62 = vld [vmem:[#allocation7 + $0x60] sm:$0xff]  }
 0x209   :  { %v749_v12 = vpop.f32.mrb[15].mxu1  ;;  %v1972_v14 = vpop.f32.mrb[19].mxu0  ;;  %2242 = vtanh.f32 %v793_v0  ;;  %v2193_v0 = vld [vmem:[#allocation7 + $0x78] sm:$0xff]   ;;  %v2194_v2 = vld [vmem:[#allocation5 + $0x180] ss:$12 sps:$4 sm:$0xff]  }
 0x20a   :  { %2244 = vtanh.f32 %v792_v8  ;;  %v2196_v6 = vld [vmem:[#allocation5 + $0x184] ss:$12 sps:$4 sm:$0xff]   ;;  %v2200_v8 = vld [vmem:[#allocation5 + $0x19c] ss:$12 sps:$4 sm:$0xff]   ;;  %v2204_v11 = vld [vmem:[#allocation5 + $0x1b4] ss:$12 sps:$4 sm:$0xff]  }
 0x20b   :  { %2246 = vtanh.f32 %v2595_v63  ;;  %v2191_v63 = vld [vmem:[#allocation7 + $0x68] sm:$0xff]   ;;  %v2198_v10 = vld [vmem:[#allocation5 + $0x198] ss:$12 sps:$4 sm:$0xff]   ;;  %v2202_v12 = vld [vmem:[#allocation5 + $0x1b0] ss:$12 sps:$4 sm:$0xff]   ;;  %v113_v14 = vsub.s32 5, %v2487_v4 }
 0x213   :  { %v2243_v16 = vpop.eup %2242 }
 0x214   :  { %v797_v9 = vmul.f32 %v2243_v16, %v2543_v5  ;;  %v2245_v50 = vpop.eup %2244  ;;  %v121_v16 = vsub.s32 7, %v2487_v4 }
 0x215   :  { %v2247_v51 = vpop.eup %2246  ;;  %v905_v52 = vsub.f32 1.0, %v2245_v50  ;;  %v2214_v50 = vld [vmem:[#allocation5 + $0x1f8] ss:$12 sps:$4 sm:$0xff]  }
 0x216   :  { %v798_v1 = vpack.c.bf16 %v797_v9, %v797_v9  ;;  %v907_v54 = vmul.f32 %v2247_v51, %v2543_v5  ;;  %v2188_v5 = vld [vmem:[#allocation7 + $0x50] sm:$0xff]   ;;  %v117_v9 = vsub.s32 6, %v2487_v4  ;;  %v2217_v51 = vld [vmem:[#allocation5 + $0x200] ss:$12 sps:$4 sm:$0xff]  }
 0x217   :  { %v1873_v4 = vld [vmem:[%s2710_s6] ss:$0 sm:$0xff] }
 0x218   :  { %1990 = vmatmul.mubr.bf16.vlgmr.msra.gmra.mrb[16].mxu1 %v798_v1  ;;  %v122_v1 = vrot.slane %v2536_v61, %v121_v16  ;;  %v2227_v16 = vld [vmem:[#allocation7 + $0x88] sm:$0xff]  }
 0x219   :  { %1994 = vmatpush3.bf16.msra.mxu1 %v2157_v17  ;;  %2009 = vmatprep.mubr.msk.bf16.mxu1 %vm2395_vm2, %v2394_v35  ;;  %v114_v17 = vrot.slane %v2536_v61, %v113_v14 }
 0x21a   :  { %1995 = vmatprep.subr.bf16.mxu1 %v2394_v35  ;;  %v422_v22 = vadd.f32 %v2567_v21, %v122_v1  ;;  %v2231_v1 = vld [vmem:[#allocation7 + $0xa8] sm:$0xff]  }
 0x21d   :  { %1996 = vmatpush3.bf16.msra.mxu1 %v2161_v7  ;;  %v118_v7 = vrot.slane %v2536_v61, %v117_v9  ;;  %v2229_v9 = vld [vmem:[#allocation7 + $0x98] sm:$0xff]  }
 0x21e   :  { %1997 = vmatprep.subr.bf16.mxu1 %v2394_v35 }
 0x21f   :  { %v420_v23 = vadd.f32 %v2564_v19, %v118_v7  ;;  %v2201_v19 = vld [vmem:[#allocation5 + $0x1a0] ss:$12 sps:$4 sm:$0xff]   ;;  %v2232_v7 = vld [vmem:[#allocation7 + $0xb0] sm:$0xff]  }
 0x221   :  { %1998 = vmatpush3.bf16.msra.mxu1 %v2165_v20  ;;  %v381_v20 = vadd.f32 %v2555_v15, %v114_v17  ;;  %v2230_v17 = vld [vmem:[#allocation7 + $0xa0] sm:$0xff]  }
 0x222   :  { %1999 = vmatprep.subr.bf16.mxu1 %v2394_v35 }
 0x225   :  { %2000 = vmatpush3.bf16.msra.mxu1 %v2169_v24 }
 0x226   :  { %2001 = vmatprep.subr.bf16.mxu1 %v2394_v35 }
 0x229   :  { %2002 = vmatpush3.bf16.msra.mxu1 %v2173_v27 }
 0x22a   :  { %2003 = vmatprep.subr.bf16.mxu1 %v2394_v35 }
 0x22d   :  { %2004 = vmatpush3.bf16.msra.mxu1 %v2177_v31 }
 0x22e   :  { %2005 = vmatprep.subr.bf16.mxu1 %v2394_v35 }
 0x231   :  { %2006 = vmatpush3.bf16.msra.mxu1 %v2181_v36 }
 0x232   :  { %2007 = vmatprep.subr.bf16.mxu1 %v2394_v35 }
 0x235   :  { %2008 = vmatpush3.bf16.msra.mxu1 %v2185_v41  ;;  %v2205_v41 = vld [vmem:[#allocation5 + $0x1b8] ss:$12 sps:$4 sm:$0xff]  }
 0x236   :  { %1433 = vmatprep.subr.bf16.mxu1 %v2196_v6 }
 0x2eb   :  { %v897_v45 = vpop.f32.mrb[16].mxu1 }
 0x2ec   :  { %v903_v46 = vadd.f32 %v897_v45, %v379_v44  ;;  %v1991_v47 = vpop.f32.mrb[17].mxu1  ;;  %v2206_v44 = vld [vmem:[#allocation5 + $0x1c8] ss:$12 sps:$4 sm:$0xff]   ;;  %v2209_v45 = vld [vmem:[#allocation5 + $0x1d0] ss:$12 sps:$4 sm:$0xff]  }
 0x2ed   :  { %v900_v48 = vpop.f32.mrb[18].mxu1  ;;  %v2210_v47 = vld [vmem:[#allocation5 + $0x1e0] ss:$12 sps:$4 sm:$0xff]  }
 0x2ee   :  { %2248 = vtanh.f32 %v903_v46  ;;  %v1992_v49 = vpop.f32.mrb[19].mxu1  ;;  %v2212_v46 = vld [vmem:[#allocation5 + $0x1e4] ss:$12 sps:$4 sm:$0xff]   ;;  %v2213_v48 = vld [vmem:[#allocation5 + $0x1e8] ss:$12 sps:$4 sm:$0xff]  }
 0x2ef   :  { %v2216_v49 = vld [vmem:[#allocation5 + $0x1fc] ss:$12 sps:$4 sm:$0xff]  }
 0x2f8   :  { %v2249_v53 = vpop.eup %2248 }
 0x2f9   :  { %v906_v55 = vmul.f32 %v2249_v53, %v905_v52  ;;  %v2220_v52 = vld [vmem:[#allocation5 + $0x214] ss:$12 sps:$4 sm:$0xff]   ;;  %v2218_v53 = vld [vmem:[#allocation5 + $0x210] ss:$12 sps:$4 sm:$0xff]  }
 0x2fb   :  { %v2615_v56 = vadd.f32 %v907_v54, %v906_v55  ;;  %v2221_v54 = vld [vmem:[#allocation5 + $0x218] ss:$12 sps:$4 sm:$0xff]   ;;  %v2222_v55 = vld [vmem:[#allocation5 + $0x228] ss:$12 sps:$4 sm:$0xff]  }
 0x2fd   :  { %v909_v13 = vpack.c.bf16 %v2615_v56, %v2615_v56 }
 0x2ff   :  { %1104 = vmatmul.mubr.bf16.vlgmr.msra.gmra.mrb[20].mxu0 %v909_v13  ;;  %2010 = vmatmul.mubr.bf16.vlgmr.msra.gmra.mrb[20].mxu1 %v909_v13  ;;  %v2225_v13 = vld [vmem:[#allocation5 + $0x230] ss:$12 sps:$4 sm:$0xff]  }
 0x300   :  { %2014 = vmatpush3.bf16.msra.mxu0 %v2186_v57  ;;  %2029 = vmatprep.mubr.msk.bf16.mxu0 %vm2395_vm2, %v2394_v35  ;;  %v2224_v57 = vld [vmem:[#allocation5 + $0x22c] ss:$12 sps:$4 sm:$0xff]  }
 0x301   :  { %2015 = vmatprep.subr.bf16.mxu0 %v2394_v35  ;;  %1465 = vmatprep.mubr.bf16.mxu1 %v2393_v3  ;;  %v2192_v3 = vld [vmem:[#allocation7 + $0x70] sm:$0xff]  }
 0x302   :  { %1434 = vmatpush1.bf16.msra.mxu1 %v2194_v2 }
 0x303   :  { %1435 = vmatprep.subr.bf16.mxu1 %v2200_v8 }
 0x304   :  { %2016 = vmatpush3.bf16.msra.mxu0 %v2187_v58  ;;  %v126_v58 = vrot.slane %v2562_v18, %v93_v60  ;;  %v2226_v60 = vld [vmem:[#allocation7 + $0x80] sm:$0xff]  }
 0x305   :  { %2017 = vmatprep.subr.bf16.mxu0 %v2394_v35 }
 0x306   :  { %1436 = vmatpush1.bf16.msra.mxu1 %v2198_v10 }
 0x307   :  { %1437 = vmatprep.subr.bf16.mxu1 %v2204_v11 }
 0x308   :  { %2018 = vmatpush3.bf16.msra.mxu0 %v2188_v5  ;;  %v461_v5 = vadd.f32 %v2573_v28, %v126_v58 }
 0x309   :  { %2019 = vmatprep.subr.bf16.mxu0 %v2394_v35 }
 0x30a   :  { %1438 = vmatpush1.bf16.msra.mxu1 %v2202_v12 }
 0x30b   :  { %1439 = vmatprep.subr.bf16.mxu1 %v2208_v43  ;;  %v142_v43 = vrot.slane %v2562_v18, %v109_v42 }
 0x30c   :  { %2020 = vmatpush3.bf16.msra.mxu0 %v2189_v59 }
 0x30d   :  { %2021 = vmatprep.subr.bf16.mxu0 %v2394_v35 }
 0x30e   :  { %1440 = vmatpush1.bf16.msra.mxu1 %v2206_v44 }
 0x30f   :  { %1441 = vmatprep.subr.bf16.mxu1 %v2212_v46 }
 0x310   :  { %2022 = vmatpush3.bf16.msra.mxu0 %v2190_v62 }
 0x311   :  { %2023 = vmatprep.subr.bf16.mxu0 %v2394_v35 }
 0x312   :  { %1442 = vmatpush1.bf16.msra.mxu1 %v2210_v47 }
 0x313   :  { %1443 = vmatprep.subr.bf16.mxu1 %v2216_v49 }
 0x314   :  { %2024 = vmatpush3.bf16.msra.mxu0 %v2191_v63 }
 0x315   :  { %2025 = vmatprep.subr.bf16.mxu0 %v2394_v35 }
 0x316   :  { %1444 = vmatpush1.bf16.msra.mxu1 %v2214_v50 }
 0x317   :  { %1445 = vmatprep.subr.bf16.mxu1 %v2220_v52 }
 0x318   :  { %2026 = vmatpush3.bf16.msra.mxu0 %v2192_v3 }
 0x319   :  { %2027 = vmatprep.subr.bf16.mxu0 %v2394_v35 }
 0x31a   :  { %1446 = vmatpush1.bf16.msra.mxu1 %v2218_v53 }
 0x31b   :  { %1447 = vmatprep.subr.bf16.mxu1 %v2224_v57 }
 0x31c   :  { %2028 = vmatpush3.bf16.msra.mxu0 %v2193_v0 }
 0x31d   :  { %2033 = vmatprep.subr.bf16.mxu0 %v2394_v35 }
 0x31e   :  { %1448 = vmatpush1.bf16.msra.mxu1 %v2222_v55 }
 0x31f   :  { %2073 = vmatprep.subr.bf16.mxu1 %v2394_v35 }
 0x3d2   :  { %v1105_v24 = vpop.f32.mrb[20].mxu0  ;;  %v1146_v25 = vpop.f32.mrb[20].mxu1 }
 0x3d3   :  { %v2639_v26 = vadd.f32 %v1105_v24, %v381_v20  ;;  %v1154_v27 = vadd.f32 %v1146_v25, %v422_v22  ;;  %v1107_v29 = vpop.f32.mrb[21].mxu0  ;;  %v2011_v30 = vpop.f32.mrb[21].mxu1  ;;  %v2233_v20 = vld [vmem:[#allocation7 + $0xb8] sm:$0xff]   ;;  %v2234_v22 = vld [vmem:[#allocation8] sm:$0xff]   ;;  %v2236_v24 = vld [vmem:[#allocation8 + $0x10] sm:$0xff]  }
 0x3d4   :  { %v1153_v31 = vadd.f32 %v1107_v29, %v420_v23  ;;  %v1109_v32 = vpop.f32.mrb[22].mxu0  ;;  %v1149_v34 = vpop.f32.mrb[22].mxu1  ;;  %v2235_v23 = vld [vmem:[#allocation8 + $0x8] sm:$0xff]  }
 0x3d5   :  { %v1110_v36 = vpop.f32.mrb[23].mxu0  ;;  %v2012_v37 = vpop.f32.mrb[23].mxu1  ;;  %2250 = vtanh.f32 %v1154_v27 }
 0x3d6   :  { %2252 = vtanh.f32 %v1153_v31 }
 0x3d7   :  { %2254 = vtanh.f32 %v2639_v26 }
 0x3df   :  { %v2251_v61 = vpop.eup %2250 }
 0x3e0   :  { %v1158_v15 = vmul.f32 %v2251_v61, %v2615_v56  ;;  %v2253_v2 = vpop.eup %2252 }
 0x3e1   :  { %v2255_v6 = vpop.eup %2254  ;;  %v1267_v8 = vsub.f32 1.0, %v2253_v2 }
 0x3e2   :  { %v1159_v21 = vpack.c.bf16 %v1158_v15, %v1158_v15  ;;  %v1269_v11 = vmul.f32 %v2255_v6, %v2615_v56  ;;  %v2228_v56 = vld [vmem:[#allocation7 + $0x90] sm:$0xff]  }
 0x3e4   :  { %2030 = vmatmul.mubr.bf16.vlgmr.msra.gmra.mrb[24].mxu0 %v1159_v21 }
 0x3e5   :  { %2034 = vmatpush3.bf16.msra.mxu0 %v2197_v39  ;;  %2049 = vmatprep.mubr.msk.bf16.mxu0 %vm2395_vm2, %v2394_v35 }
 0x3e6   :  { %2035 = vmatprep.subr.bf16.mxu0 %v2394_v35 }
 0x3e9   :  { %2036 = vmatpush3.bf16.msra.mxu0 %v2201_v19  ;;  %v2237_v19 = vld [vmem:[#allocation8 + $0x18] sm:$0xff]  }
 0x3ea   :  { %2037 = vmatprep.subr.bf16.mxu0 %v2394_v35 }
 0x3ed   :  { %2038 = vmatpush3.bf16.msra.mxu0 %v2205_v41  ;;  %v2241_v41 = vld [vmem:[#allocation8 + $0x38] sm:$0xff]  }
 0x3ee   :  { %2039 = vmatprep.subr.bf16.mxu0 %v2394_v35 }
 0x3f1   :  { %2040 = vmatpush3.bf16.msra.mxu0 %v2209_v45 }
 0x3f2   :  { %2041 = vmatprep.subr.bf16.mxu0 %v2394_v35 }
 0x3f5   :  { %2042 = vmatpush3.bf16.msra.mxu0 %v2213_v48 }
 0x3f6   :  { %2043 = vmatprep.subr.bf16.mxu0 %v2394_v35 }
 0x3f9   :  { %2044 = vmatpush3.bf16.msra.mxu0 %v2217_v51 }
 0x3fa   :  { %2045 = vmatprep.subr.bf16.mxu0 %v2394_v35 }
 0x3fd   :  { %2046 = vmatpush3.bf16.msra.mxu0 %v2221_v54 }
 0x3fe   :  { %2047 = vmatprep.subr.bf16.mxu0 %v2394_v35 }
 0x401   :  { %2048 = vmatpush3.bf16.msra.mxu0 %v2225_v13 }
 0x402   :  { %2053 = vmatprep.subr.bf16.mxu0 %v2394_v35 }
 0x4b7   :  { %v1259_v59 = vpop.f32.mrb[24].mxu0 }
 0x4b8   :  { %v1265_v62 = vadd.f32 %v1259_v59, %v461_v5  ;;  %v2031_v63 = vpop.f32.mrb[25].mxu0 }
 0x4b9   :  { %v1262_v3 = vpop.f32.mrb[26].mxu0 }
 0x4ba   :  { %2256 = vtanh.f32 %v1265_v62  ;;  %v2032_v0 = vpop.f32.mrb[27].mxu0 }
 0x4c4   :  { %v2257_v10 = vpop.eup %2256 }
 0x4c5   :  { %v1268_v12 = vmul.f32 %v2257_v10, %v1267_v8 }
 0x4c7   :  { %v2659_v14 = vadd.f32 %v1269_v11, %v1268_v12 }
 0x4c9   :  { %v1271_v28 = vpack.c.bf16 %v2659_v14, %v2659_v14 }
 0x4cb   :  { %1466 = vmatmul.mubr.bf16.vlgmr.msra.gmra.mrb[24].mxu1 %v1271_v28  ;;  %2050 = vmatmul.mubr.bf16.vlgmr.msra.gmra.mrb[28].mxu0 %v1271_v28 }
 0x4cc   :  { %2054 = vmatpush3.bf16.msra.mxu0 %v2226_v60  ;;  %2069 = vmatprep.mubr.msk.bf16.mxu0 %vm2395_vm2, %v2394_v35 }
 0x4cd   :  { %2055 = vmatprep.subr.bf16.mxu0 %v2394_v35  ;;  %2089 = vmatprep.mubr.msk.bf16.mxu1 %vm2395_vm2, %v2394_v35 }
 0x4ce   :  { %2074 = vmatpush3.bf16.msra.mxu1 %v2234_v22 }
 0x4cf   :  { %2075 = vmatprep.subr.bf16.mxu1 %v2394_v35 }
 0x4d0   :  { %2056 = vmatpush3.bf16.msra.mxu0 %v2227_v16 }
 0x4d1   :  { %2057 = vmatprep.subr.bf16.mxu0 %v2394_v35 }
 0x4d2   :  { %2076 = vmatpush3.bf16.msra.mxu1 %v2235_v23 }
 0x4d3   :  { %2077 = vmatprep.subr.bf16.mxu1 %v2394_v35 }
 0x4d4   :  { %2058 = vmatpush3.bf16.msra.mxu0 %v2228_v56 }
 0x4d5   :  { %2059 = vmatprep.subr.bf16.mxu0 %v2394_v35 }
 0x4d6   :  { %2078 = vmatpush3.bf16.msra.mxu1 %v2236_v24 }
 0x4d7   :  { %2079 = vmatprep.subr.bf16.mxu1 %v2394_v35 }
 0x4d8   :  { %2060 = vmatpush3.bf16.msra.mxu0 %v2229_v9 }
 0x4d9   :  { %2061 = vmatprep.subr.bf16.mxu0 %v2394_v35 }
 0x4da   :  { %2080 = vmatpush3.bf16.msra.mxu1 %v2237_v19 }
 0x4db   :  { %2081 = vmatprep.subr.bf16.mxu1 %v2394_v35 }
 0x4dc   :  { %2062 = vmatpush3.bf16.msra.mxu0 %v2230_v17 }
 0x4dd   :  { %2063 = vmatprep.subr.bf16.mxu0 %v2394_v35 }
 0x4e0   :  { %2064 = vmatpush3.bf16.msra.mxu0 %v2231_v1 }
 0x4e1   :  { %2065 = vmatprep.subr.bf16.mxu0 %v2394_v35 }
 0x4e4   :  { %2066 = vmatpush3.bf16.msra.mxu0 %v2232_v7 }
 0x4e5   :  { %2067 = vmatprep.subr.bf16.mxu0 %v2394_v35 }
 0x4e8   :  { %2068 = vmatpush3.bf16.msra.mxu0 %v2233_v20 }
 0x59e   :  { %v1467_v25 = vpop.f32.mrb[24].mxu1  ;;  %v1508_v26 = vpop.f32.mrb[28].mxu0 }
 0x59f   :  { %v1514_v27 = vadd.f32 %v1467_v25, %v2578_v33  ;;  %v1516_v29 = vadd.f32 %v1508_v26, %v2582_v40  ;;  %v1469_v30 = vpop.f32.mrb[25].mxu1  ;;  %v2051_v31 = vpop.f32.mrb[29].mxu0  ;;  %v2238_v33 = vld [vmem:[#allocation8 + $0x20] sm:$0xff]   ;;  %v2239_v40 = vld [vmem:[#allocation8 + $0x28] sm:$0xff]  }
 0x5a0   :  { %v1515_v32 = vadd.f32 %v1469_v30, %v2580_v38  ;;  %v1471_v34 = vpop.f32.mrb[26].mxu1  ;;  %v1511_v36 = vpop.f32.mrb[30].mxu0  ;;  %2082 = vmatpush3.bf16.msra.mxu1 %v2238_v33  ;;  %v2240_v38 = vld [vmem:[#allocation8 + $0x30] sm:$0xff]  }
 0x5a1   :  { %v1472_v37 = vpop.f32.mrb[27].mxu1  ;;  %v2052_v61 = vpop.f32.mrb[31].mxu0  ;;  %2258 = vtanh.f32 %v1516_v29  ;;  %2083 = vmatprep.subr.bf16.mxu1 %v2394_v35 }
 0x5a2   :  { %2260 = vtanh.f32 %v1515_v32 }
 0x5a3   :  { %2262 = vtanh.f32 %v1514_v27 }
 0x5a4   :  { %2084 = vmatpush3.bf16.msra.mxu1 %v2239_v40 }
 0x5a5   :  { %2085 = vmatprep.subr.bf16.mxu1 %v2394_v35 }
 0x5a8   :  { %2086 = vmatpush3.bf16.msra.mxu1 %v2240_v38 }
 0x5a9   :  { %2087 = vmatprep.subr.bf16.mxu1 %v2394_v35 }
 0x5ab   :  { %v2259_v15 = vpop.eup %2258 }
 0x5ac   :  { %v1520_v39 = vmul.f32 %v2259_v15, %v2659_v14  ;;  %2088 = vmatpush3.bf16.msra.mxu1 %v2241_v41  ;;  %v2261_v49 = vpop.eup %2260 }
 0x5ad   :  { %v2263_v50 = vpop.eup %2262  ;;  %v1629_v51 = vsub.f32 1.0, %v2261_v49 }
 0x5ae   :  { %v1521_v21 = vpack.c.bf16 %v1520_v39, %v1520_v39  ;;  %v1631_v35 = vmul.f32 %v2263_v50, %v2659_v14 }
 0x5b0   :  { %2070 = vmatmul.mubr.bf16.vlgmr.msra.gmra.mrb[12].mxu0 %v1521_v21 }
 0x683   :  { %v1621_v44 = vpop.f32.mrb[12].mxu0 }
 0x684   :  { %v2093_v45 = vadd.f32 %v1621_v44, %v142_v43  ;;  %v2071_v46 = vpop.f32.mrb[13].mxu0 }
 0x685   :  { %v1624_v47 = vpop.f32.mrb[14].mxu0 }
 0x686   :  { %2264 = vtanh.f32 %v2093_v45  ;;  %v2072_v48 = vpop.f32.mrb[15].mxu0 }
 0x690   :  { %v2265_v52 = vpop.eup %2264 }
 0x691   :  { %v1630_v53 = vmul.f32 %v2265_v52, %v1629_v51 }
 0x693   :  { %v1632_v54 = vadd.f32 %v1631_v35, %v1630_v53 }
 0x695   :  { %v1633_v55 = vpack.c.bf16 %v1632_v54, %v1632_v54 }
 0x697   :  { %2090 = vmatmul.mubr.bf16.vlgmr.msra.gmra.mrb[28].mxu1 %v1633_v55 }
 0x76a   :  { %v1739_v18 = vpop.f32.mrb[28].mxu1 }
 0x76b   :  { %v1740_v42 = vadd.f32 %v1873_v4, %v1739_v18  ;;  %v2091_v57 = vpop.f32.mrb[29].mxu1 }
 0x76c   :  { %v1742_v13 = vpop.f32.mrb[30].mxu1 }
 0x76d   :  { %1745 = vst [vmem:[#allocation10] sm:$0xff] %v1740_v42  ;;  %v2092_v58 = vpop.f32.mrb[31].mxu1 }
 0x76e   :  { %2365 = shalt.err (!%p2362_p8)
}
 0x76f   :  { %s2366_s6 = scalar_lea.hbm %s2711_s7, 128 }
 0x770   :  { %p2367_p9 = scmp.ne.s32.totalorder %s2711_s7, %s2366_s6  ;;  %p2370_p10 = scmp.lt.u32.totalorder %s2366_s6, %s2711_s7 }
 0x772   :  { %p2372_p11 = pnand %p2370_p10, %p2367_p9 }
 0x774   :  { %2375 = shalt.err (!%p2372_p11)
}
 0x775   :  { %1755 = dma.vmem_to_hbm [thread:$0]  %s1753_s9, 128, %s2711_s7, [#allocation4]  }
 0x776   :  { %2382 = dma.done.wait [#allocation4], 128  }
 0x777   :  { %2383 = vsyncadd [#allocation4], 4294967168 }
 0x778   :  { %1759 = vsyncpa [#allocation3], 1 }
 0x779   :  { %1760 = vsyncpa [#allocation6], 1 }
 0x77a   :  { %1761 = vsyncpa [#allocation9], 1 }
 0x77b   :  { %1762 = vsyncpa [#allocation4], 1 }

</bundles_post_ra>
